<compile_context>
chip_gen: v7x
topology: tpu7x:2x2x1
jax: 0.10.0
libtpu: 0.0.40
codegen_flags: <defaults>
</compile_context>

<pallas_src>
import functools
import math

import jax
import jax.numpy as jnp
from jax.experimental import pallas as pl
from jax.experimental.pallas import tpu as pltpu


# ---------------------------------------------------------------------------
# Kernels
# ---------------------------------------------------------------------------

def _instance_norm_kernel(x_ref, o_ref):
    """Fast path: full T resident, per-row mean/var are lane reductions."""
    x = x_ref[...].astype(jnp.float32)
    inv_n = 1.0 / x.shape[-1]
    mean = jnp.sum(x, axis=-1, keepdims=True) * inv_n
    centered = x - mean
    # Population (biased) variance, no eps (faithful to the module).
    var = jnp.sum(centered * centered, axis=-1, keepdims=True) * inv_n
    o_ref[...] = (centered * jax.lax.rsqrt(var)).astype(o_ref.dtype)


def _instance_norm_chunked_kernel(total_t, x_ref, o_ref, sum_ref, sumsq_ref):
    """Large-T fallback. Grid = (row_blocks, 2 passes, T chunks).

    Pass p=0 accumulates per-row sum / sum-of-squares over all T chunks into
    VMEM scratch; pass p=1 finalizes mean / rsqrt(var) on its first chunk and
    then normalizes + writes every chunk.  The output index_map parks all
    p=0 steps on block (i, 0), so output HBM traffic is written exactly once.
    """
    p = pl.program_id(1)
    k = pl.program_id(2)
    x = x_ref[...].astype(jnp.float32)
    t_chunk = x.shape[-1]

    @pl.when(jnp.logical_and(p == 0, k == 0))
    def _():
        sum_ref[...] = jnp.zeros_like(sum_ref)
        sumsq_ref[...] = jnp.zeros_like(sumsq_ref)

    @pl.when(p == 0)
    def _():
        # Mask the partial last T chunk so out-of-bounds lanes don't pollute
        # the reductions (OOB writes are dropped, but OOB reads are garbage).
        col = jax.lax.broadcasted_iota(jnp.int32, x.shape, x.ndim - 1)
        valid = (col + k * t_chunk) < total_t
        xm = jnp.where(valid, x, 0.0)
        sum_ref[...] += jnp.sum(xm, axis=-1, keepdims=True)
        sumsq_ref[...] += jnp.sum(xm * xm, axis=-1, keepdims=True)

    @pl.when(jnp.logical_and(p == 1, k == 0))
    def _():
        inv_n = 1.0 / total_t
        mean = sum_ref[...] * inv_n
        # E[x^2] - E[x]^2 in f32; clamp tiny negatives from cancellation.
        var = jnp.maximum(sumsq_ref[...] * inv_n - mean * mean, 0.0)
        sum_ref[...] = mean                    # scratch now holds mean
        sumsq_ref[...] = jax.lax.rsqrt(var)    # scratch now holds 1/std

    @pl.when(p == 1)
    def _():
        o_ref[...] = ((x - sum_ref[...]) * sumsq_ref[...]).astype(o_ref.dtype)


# ---------------------------------------------------------------------------
# Hardware-aware sizing
# ---------------------------------------------------------------------------

def _vmem_capacity_bytes():
    try:
        info = pltpu.get_tpu_info()
        for name in ("vmem_capacity_bytes", "vmem_size_bytes", "vmem_bytes"):
            v = getattr(info, name, None)
            if v:
                return int(v)
    except Exception:
        pass
    return 64 * 1024 * 1024  # conservative default (v7x per-TensorCore VMEM)


def _num_tensorcores():
    try:
        kind = jax.devices()[0].device_kind.lower()
    except Exception:
        return 1
    # v7x / v4 / v5p expose 2 TensorCores per chip (megacore); v5e / v6e: 1.
    if "v7" in kind or "v4" in kind or "v5p" in kind or "v5 p" in kind:
        return 2
    return 1


def _budgets():
    cap = _vmem_capacity_bytes()
    # Tile throughput plateaus at a few MiB, so stay well below the per-TC
    # VMEM ceiling on every generation (v7x: 64 MiB; v5e/v6e: 128 MiB).
    tile_budget = min(16 * 1024 * 1024, cap // 4)
    vmem_limit = min(32 * 1024 * 1024, cap // 2)
    return tile_budget, vmem_limit


def _pick_block_rows(rows, t, itemsize, tile_budget, num_cores):
    # Sublane packing granularity: 8 rows for 32-bit, 16 for 16-bit, 32 for 8-bit.
    granularity = max(8, 32 // itemsize)
    # Honest per-row VMEM model: 3 input buffers + 2 output buffers (input
    # dtype) plus ~2 live f32 temporaries inside the kernel.
    bytes_per_row = t * (5 * itemsize + 8)
    rows_g = pl.cdiv(rows, granularity)                 # number of sublane groups
    m_budget = max(1, tile_budget // (bytes_per_row * granularity))
    m = min(m_budget, rows_g)                           # 1-TC chips: largest block
    if num_cores > 1 and rows_g >= 2 * num_cores:
        # Megacore (v7x): target >= ~4 steps per TensorCore when rows allow...
        want_steps = min(4 * num_cores, rows_g)
        m = min(m, max(1, rows_g // want_steps))
        steps = pl.cdiv(rows_g, m)
        if steps % num_cores != 0:
            # ...and an even grid so both cores get the same number of blocks.
            first = steps + (num_cores - steps % num_cores)
            for s in range(first, min(rows_g, steps + 8 * num_cores) + 1, num_cores):
                cand = (rows_g - 1) // (s - 1) if s > 1 else rows_g
                cand = max(1, min(cand, m))
                if pl.cdiv(rows_g, cand) == s:
                    m = cand
                    break
    block_rows = m * granularity
    return rows if block_rows >= rows else block_rows


def _pick_t_chunk(t, granularity, itemsize, tile_budget):
    # (granularity x t_chunk) tile: 2 in-bufs + 2 out-bufs + ~2 f32 temps/elem.
    bytes_per_col = granularity * (4 * itemsize + 8)
    t_chunk = (tile_budget // bytes_per_col) // 128 * 128
    return max(128, t_chunk)


def _input_spec(block_rows, t, steps):
    index_map = lambda i: (i, 0)
    if steps >= 3:
        # Triple-buffer the input: per-step compute is tiny vs the HBM DMA, so
        # a third buffer hides DMA-issue latency (accounted in bytes_per_row).
        try:
            return pl.BlockSpec((block_rows, t), index_map,
                                pipeline_mode=pl.Buffered(3))
        except (TypeError, AttributeError):
            pass  # older jax without pipeline_mode: fall back to double buffer
    return pl.BlockSpec((block_rows, t), index_map)


# ---------------------------------------------------------------------------
# pallas_call wrappers
# ---------------------------------------------------------------------------

def _full_t_call(x2, block_rows, vmem_limit):
    rows, t = x2.shape
    itemsize = jnp.dtype(x2.dtype).itemsize
    steps = pl.cdiv(rows, block_rows)
    return pl.pallas_call(
        _instance_norm_kernel,
        out_shape=jax.ShapeDtypeStruct((rows, t), x2.dtype),
        grid_spec=pltpu.PrefetchScalarGridSpec(
            num_scalar_prefetch=0,
            grid=(steps,),
            in_specs=[_input_spec(block_rows, t, steps)],
            out_specs=pl.BlockSpec((block_rows, t), lambda i: (i, 0)),
        ),
        compiler_params=pltpu.CompilerParams(
            dimension_semantics=("parallel",),
            vmem_limit_bytes=vmem_limit,
        ),
        cost_estimate=pl.CostEstimate(
            flops=5 * rows * t,
            transcendentals=rows,
            bytes_accessed=2 * rows * t * itemsize,
        ),
    )(x2)


def _chunked_call(x2, t_chunk, granularity, vmem_limit):
    rows, t = x2.shape
    itemsize = jnp.dtype(x2.dtype).itemsize
    block_rows = granularity if granularity < rows else rows
    kt = pl.cdiv(t, t_chunk)
    kernel = functools.partial(_instance_norm_chunked_kernel, t)
    return pl.pallas_call(
        kernel,
        out_shape=jax.ShapeDtypeStruct((rows, t), x2.dtype),
        grid_spec=pltpu.PrefetchScalarGridSpec(
            num_scalar_prefetch=0,
            grid=(pl.cdiv(rows, block_rows), 2, kt),
            in_specs=[pl.BlockSpec((block_rows, t_chunk),
                                   lambda i, p, k: (i, k))],
            # p=0 steps park the output window on block (i, 0); it is only
            # written (with correct data) at p=1, so output HBM traffic = 1x.
            out_specs=pl.BlockSpec((block_rows, t_chunk),
                                   lambda i, p, k: (i, k * p)),
            scratch_shapes=[pltpu.VMEM((block_rows, 1), jnp.float32),
                            pltpu.VMEM((block_rows, 1), jnp.float32)],
        ),
        compiler_params=pltpu.CompilerParams(
            dimension_semantics=("parallel", "arbitrary", "arbitrary"),
            vmem_limit_bytes=vmem_limit,
        ),
        cost_estimate=pl.CostEstimate(
            flops=7 * rows * t,
            transcendentals=rows,
            bytes_accessed=3 * rows * t * itemsize,
        ),
    )(x2)


def instance_norm(x, *, _force_t_chunk=None, _force_block_rows=None):
    """InstanceNorm_v2(mean_dim=-1, norm_dim=-1) forward over the last axis.

    No eps (faithful to the PyTorch module): constant rows give inf/NaN.
    """
    orig_shape = x.shape
    t = orig_shape[-1]
    rows = int(math.prod(orig_shape[:-1]))
    x2 = x.reshape(rows, t)

    itemsize = jnp.dtype(x.dtype).itemsize
    granularity = max(8, 32 // itemsize)
    tile_budget, vmem_limit = _budgets()
    num_cores = _num_tensorcores()

    # TODO(synk): for T < 128 (masked vst.msk partial stores) a transposed
    # layout with rows on the lane axis would be faster; correct as-is.

    bytes_per_row = t * (5 * itemsize + 8)
    fits_full_t = granularity * bytes_per_row <= tile_budget

    if _force_t_chunk is not None:
        t_chunk = int(_force_t_chunk)
    elif not fits_full_t:
        t_chunk = _pick_t_chunk(t, granularity, itemsize, tile_budget)
    else:
        t_chunk = None

    if t_chunk is not None and t_chunk < t:
        out = _chunked_call(x2, t_chunk, granularity, vmem_limit)
    else:
        if _force_block_rows is not None:
            block_rows = int(_force_block_rows)
        else:
            block_rows = _pick_block_rows(rows, t, itemsize, tile_budget,
                                          num_cores)
        out = _full_t_call(x2, block_rows, vmem_limit)

    return out.reshape(orig_shape)


if __name__ == "__main__":
    # InstanceNorm_v2 has no learnable parameters.
    key = jax.random.PRNGKey(0)
    k1, k2, k3 = jax.random.split(key, 3)

    def ref_fn(x):
        mean = jnp.mean(x, axis=-1, keepdims=True)
        c = x - mean
        rms = jnp.sqrt(jnp.mean(c * c, axis=-1, keepdims=True))
        return c / rms

    # 1) Fast path, single block.
    x1 = jax.random.normal(k1, (2, 4, 256), dtype=jnp.float32) * 5.0 - 3.0
    y1 = jax.block_until_ready(instance_norm(x1))
    err1 = float(jnp.max(jnp.abs(y1 - ref_fn(x1))))
    assert err1 < 1e-4, f"fast path mismatch: {err1}"

    # 2) Fast path, multi-step grid (exercises triple-buffered input).
    x2 = jax.random.normal(k2, (4, 8, 256), dtype=jnp.float32) * 2.0 + 1.0
    y2 = jax.block_until_ready(instance_norm(x2, _force_block_rows=8))
    err2 = float(jnp.max(jnp.abs(y2 - ref_fn(x2))))
    assert err2 < 1e-4, f"multi-step fast path mismatch: {err2}"

    # 3) Chunked large-T path (forced small chunk): partial row block and
    #    partial T chunk exercise the masking and the 2-pass accumulators.
    x3 = jax.random.normal(k3, (3, 5, 200), dtype=jnp.float32) * 3.0 - 1.0
    y3 = jax.block_until_ready(instance_norm(x3, _force_t_chunk=128))
    err3 = float(jnp.max(jnp.abs(y3 - ref_fn(x3))))
    assert err3 < 1e-4, f"chunked path mismatch: {err3}"

    print("KERNEL_OK")
</pallas_src>

<mosaic_0001>
module attributes {stable_mosaic.version = 11 : i64} {
  func.func @_instance_norm_kernel(%arg0: i32, %arg1: memref<8x256xf32, #tpu.memory_space<vmem>>, %arg2: memref<8x256xf32, #tpu.memory_space<vmem>>) attributes {dimension_semantics = [#tpu.dimension_semantics<parallel>], iteration_bounds = array<i64: 1>, scalar_prefetch = 0 : i64, scratch_operands = 0 : i64, tpu.core_type = #tpu.core_type<tc>, window_params = [{transform_indices = @transform_0, window_bounds = array<i64: 8, 256>}, {transform_indices = @transform_1, window_bounds = array<i64: 8, 256>}]} {
    %c0 = arith.constant 0 : index
    %c0_0 = arith.constant 0 : index
    %0 = vector.load %arg1[%c0, %c0_0] : memref<8x256xf32, #tpu.memory_space<vmem>>, vector<8x256xf32>
    %cst = arith.constant dense<0.000000e+00> : vector<8xf32>
    %1 = vector.multi_reduction <add>, %0, %cst [1] : vector<8x256xf32> to vector<8xf32>
    %2 = vector.shape_cast %1 : vector<8xf32> to vector<8x1xf32>
    %cst_1 = arith.constant 3.906250e-03 : f32
    %3 = vector.broadcast %cst_1 : f32 to vector<8x1xf32>
    %4 = arith.mulf %2, %3 : vector<8x1xf32>
    %5 = vector.broadcast %4 : vector<8x1xf32> to vector<8x256xf32>
    %6 = arith.subf %0, %5 : vector<8x256xf32>
    %7 = arith.mulf %6, %6 : vector<8x256xf32>
    %cst_2 = arith.constant dense<0.000000e+00> : vector<8xf32>
    %8 = vector.multi_reduction <add>, %7, %cst_2 [1] : vector<8x256xf32> to vector<8xf32>
    %9 = vector.shape_cast %8 : vector<8xf32> to vector<8x1xf32>
    %cst_3 = arith.constant 3.906250e-03 : f32
    %10 = vector.broadcast %cst_3 : f32 to vector<8x1xf32>
    %11 = arith.mulf %9, %10 : vector<8x1xf32>
    %12 = math.rsqrt %11 : vector<8x1xf32>
    %13 = vector.broadcast %12 : vector<8x1xf32> to vector<8x256xf32>
    %14 = arith.mulf %6, %13 : vector<8x256xf32>
    %c0_4 = arith.constant 0 : index
    %c0_5 = arith.constant 0 : index
    %15 = vector.load %arg2[%c0_4, %c0_5] : memref<8x256xf32, #tpu.memory_space<vmem>>, vector<8x256xf32>
    tpu.vector_store %arg2[%c0_4, %c0_5], %14 {strides = array<i32>} : memref<8x256xf32, #tpu.memory_space<vmem>>, vector<8x256xf32>,
    return
  }
  func.func @transform_0(%arg0: i32) -> (i32, i32) {
    %c0_i32 = arith.constant 0 : i32
    %c0_i32_0 = arith.constant 0 : i32
    return %arg0, %c0_i32 : i32, i32
  }
  func.func @transform_1(%arg0: i32) -> (i32, i32) {
    %c0_i32 = arith.constant 0 : i32
    %c0_i32_0 = arith.constant 0 : i32
    return %arg0, %c0_i32 : i32, i32
  }
}

</mosaic_0001>

<bundles_post_ra>
// kernel: tpu_custom_call.1
= control target key start
LH: loop header
LB: loop body
LE: loop exit
PB: predicated region body
PF: predicated region fallthrough
CT: control target
= control target key end

     0   :  { %6 = vsyncpa [#allocation3], 0  ;;  %s143_s0 = inlined_call_operand.hbm [shape: f32[8,256], index: 0, kind: input, shape index: {}]   ;;  %s144_s1 = inlined_call_operand.hbm [shape: f32[8,256], index: 1, kind: output, shape index: {}]  }
   0x1   :  { %7 = vsyncpa [#allocation4], 0  ;;  %s107_s6 = smov [#allocation2]   ;;  %s59_s10 = scalar_lea.hbm %s143_s0, 256 }
   0x2   :  { %s14_s7 = sshll.u32 %s107_s6, 4  ;;  %p60_p0 = scmp.ne.s32.totalorder %s143_s0, %s59_s10  ;;  %s15_s7 = int_to_ptr.vmem [resolvable:$true] %s14_s7 }
   0x3   :  { %p63_p1 = scmp.lt.u32.totalorder %s59_s10, %s143_s0 }
   0x5   :  { %p65_p2 = pnand %p63_p1, %p60_p0 }
   0x7   :  { %68 = shalt.err (!%p65_p2)
}
   0x8   :  { %s69_s15 = scalar_lea.vmem %s15_s7, 256  ;;  %p74_p4 = scmp.lt.s32.totalorder %s15_s7, %s15_s7 }
   0x9   :  { %p70_p3 = scmp.ne.s32.totalorder %s15_s7, %s69_s15  ;;  %p75_p5 = scmp.lt.s32.totalorder %s69_s15, %s69_s15 }
   0xb   :  { %p76_p6 = por %p75_p5, %p74_p4 }
   0xd   :  { %p77_p7 = pnand %p76_p6, %p70_p3 }
   0xf   :  { %80 = shalt.err (!%p77_p7)
}
  0x10   :  { %17 = dma.hbm_to_vmem [thread:$0]  %s143_s0, 256, %s15_s7, [#allocation3]  }
  0x11   :  { %103 = dma.done.wait [#allocation3], 256  }
  0x12   :  { %104 = vsyncadd [#allocation3], 4294967040  ;;  %v21_v0 = vld [vmem:[#allocation2] sm:$0xff]  ;;  %v22_v1 = vld [vmem:[#allocation2 + $0x8] sm:$0xff]  ;;  %s108_s18 = smov [#allocation5]  }
  0x13   :  { %v23_v2 = vadd.f32 %v22_v1, %v21_v0  ;;  %s46_s19 = sshll.u32 %s108_s18, 4  ;;  %s47_s19 = int_to_ptr.vmem [resolvable:$true] %s46_s19 }
  0x14   :  { %s81_s0 = scalar_lea.vmem %s47_s19, 256  ;;  %p86_p9 = scmp.lt.s32.totalorder %s47_s19, %s47_s19 }
  0x15   :  { %24 = vadd.xlane.f32.xlu0 %v23_v2  ;;  %p82_p8 = scmp.ne.s32.totalorder %s47_s19, %s81_s0  ;;  %p87_p10 = scmp.lt.s32.totalorder %s81_s0, %s81_s0 }
  0x17   :  { %p88_p11 = por %p87_p10, %p86_p9 }
  0x19   :  { %p89_p12 = pnand %p88_p11, %p82_p8 }
  0xa2   :  { %v25_v3 = vpop.xlane.xlu0 %24 }
  0xa3   :  { %v26_v4 = vmul.f32 0.00390625, %v25_v3 }
  0xa5   :  { %v27_v5 = vsub.f32 %v21_v0, %v26_v4  ;;  %v28_v6 = vsub.f32 %v22_v1, %v26_v4 }
  0xa7   :  { %v29_v7 = vmul.f32 %v27_v5, %v27_v5  ;;  %v30_v8 = vmul.f32 %v28_v6, %v28_v6 }
  0xa9   :  { %v31_v9 = vadd.f32 %v30_v8, %v29_v7 }
  0xab   :  { %32 = vadd.xlane.f32.xlu0 %v31_v9 }
 0x138   :  { %v33_v10 = vpop.xlane.xlu0 %32 }
 0x139   :  { %v34_v11 = vmul.f32 0.00390625, %v33_v10 }
 0x13b   :  { %57 = vrsqrt.f32 %v34_v11 }
 0x145   :  { %v58_v12 = vpop.eup %57 }
 0x146   :  { %v36_v13 = vmul.f32 %v58_v12, %v27_v5  ;;  %v37_v14 = vmul.f32 %v58_v12, %v28_v6 }
 0x148   :  { %38 = vst [vmem:[#allocation5] sm:$0xff] %v36_v13  ;;  %39 = vst [vmem:[#allocation5 + $0x8] sm:$0xff] %v37_v14 }
 0x149   :  { %92 = shalt.err (!%p89_p12)
}
 0x14a   :  { %s93_s22 = scalar_lea.hbm %s144_s1, 256 }
 0x14b   :  { %p94_p13 = scmp.ne.s32.totalorder %s144_s1, %s93_s22  ;;  %p97_p0 = scmp.lt.u32.totalorder %s93_s22, %s144_s1 }
 0x14d   :  { %p99_p1 = pnand %p97_p0, %p94_p13 }
 0x14f   :  { %102 = shalt.err (!%p99_p1)
}
 0x150   :  { %49 = dma.vmem_to_hbm [thread:$0]  %s47_s19, 256, %s144_s1, [#allocation4]  }
 0x151   :  { %105 = dma.done.wait [#allocation4], 256  }
 0x152   :  { %106 = vsyncadd [#allocation4], 4294967040 }
 0x153   :  { %53 = vsyncpa [#allocation3], 1 }
 0x154   :  { %54 = vsyncpa [#allocation4], 1 }

</bundles_post_ra>
